<compile_context>
chip_gen: v5e
topology: v5e:2x2
jax: 0.10.0
libtpu: 0.0.40
codegen_flags: <defaults>
</compile_context>

<pallas_src>
import jax
import jax.numpy as jnp
from jax.experimental import pallas as pl
from jax.experimental.pallas import tpu as pltpu

N_QUBITS = 2
N_WEIGHTS = 4           # RealAmplitudes(2, reps=1): 2 qubits x 2 rotation layers
STATE_DIM = 2 ** N_QUBITS

LANE_TILE_MAX = 4096    # lanes per grid step (multiple of 128); 2x4096 f32 tile = 32 KiB


# ----------------------------- parameter setup (plain JAX glue) -----------------------------

def _ry(theta):
    c = jnp.cos(theta / 2.0)
    s = jnp.sin(theta / 2.0)
    return jnp.stack([jnp.stack([c, -s]), jnp.stack([s, c])]).astype(jnp.float32)


def build_ansatz_unitary(weights):
    """RealAmplitudes(2, reps=1): RY(w0)q0, RY(w1)q1, CX(0->1), RY(w2)q0, RY(w3)q1.

    Basis index i = 2*q1 + q0 (qiskit little-endian). Returns real (4, 4) unitary.
    """
    l1 = jnp.kron(_ry(weights[1]), _ry(weights[0]))   # kron(op_q1, op_q0)
    l2 = jnp.kron(_ry(weights[3]), _ry(weights[2]))
    # CX control q0, target q1: swaps basis states |01> <-> |11>  (indices 1 and 3)
    cx = jnp.array([[1.0, 0.0, 0.0, 0.0],
                    [0.0, 0.0, 0.0, 1.0],
                    [0.0, 0.0, 1.0, 0.0],
                    [0.0, 1.0, 0.0, 0.0]], dtype=jnp.float32)
    return l2 @ cx @ l1


def build_quadratic_form(weights):
    """M = A^T diag(1,-1,-1,1) A, so <Z⊗Z> = psi0^T M psi0 (real symmetric 4x4)."""
    a = build_ansatz_unitary(weights)
    z = jnp.array([1.0, -1.0, -1.0, 1.0], dtype=jnp.float32)
    return a.T @ (z[:, None] * a)


# --------------------------------------- Pallas kernel ---------------------------------------

def qdisc_kernel(m_ref, xt_ref, out_ref):
    # m_ref:   SMEM (16,)   flattened symmetric M = A^T Z A
    # xt_ref:  VMEM (2, TB) input angles, batch on the lane axis
    # out_ref: VMEM (2, TB) rows = [e, 1 - e]
    half = xt_ref[...] * 0.5
    c = jnp.cos(half)                      # one full-width EUP op covers both feature rows
    s = jnp.sin(half)
    c0, s0 = c[0:1, :], s[0:1, :]
    c1, s1 = c[1:2, :], s[1:2, :]
    # feature-map amplitudes RY(x0)|0> ⊗ RY(x1)|0>, basis index i = 2*q1 + q0
    p0 = c1 * c0
    p1 = c1 * s0
    p2 = s1 * c0
    p3 = s1 * s0
    # e = psi0^T M psi0: 10 unique terms of the symmetric 4x4 form, pure lane-dense VPU FMAs
    e = (m_ref[0] * (p0 * p0) + m_ref[5] * (p1 * p1)
         + m_ref[10] * (p2 * p2) + m_ref[15] * (p3 * p3)
         + 2.0 * (m_ref[1] * (p0 * p1) + m_ref[2] * (p0 * p2) + m_ref[3] * (p0 * p3)
                  + m_ref[6] * (p1 * p2) + m_ref[7] * (p1 * p3) + m_ref[11] * (p2 * p3)))
    out_ref[0:1, :] = e
    out_ref[1:2, :] = 1.0 - e


def _pallas_forward(x, weights, *, lane_tile_max=LANE_TILE_MAX):
    x = x.astype(jnp.float32)
    B = x.shape[0]
    m_flat = build_quadratic_form(weights).reshape(16)     # (16,) -> SMEM, no VMEM 4x4 tile

    # Lane tile: multiple of 128, adapted to the batch, capped to keep VMEM tiny.
    b128 = 128 * pl.cdiv(B, 128)
    lane_tile = min(lane_tile_max, b128)
    b_pad = lane_tile * pl.cdiv(B, lane_tile)

    x_t = x.T                                              # (2, B): batch on the lane axis
    if b_pad != B:
        x_t = jnp.pad(x_t, ((0, 0), (0, b_pad - B)))

    out_t = pl.pallas_call(
        qdisc_kernel,
        out_shape=jax.ShapeDtypeStruct((2, b_pad), jnp.float32),
        grid=(b_pad // lane_tile,),
        in_specs=[
            pl.BlockSpec(memory_space=pltpu.MemorySpace.SMEM),   # whole (16,) in scalar memory
            pl.BlockSpec((2, lane_tile), lambda i: (0, i)),
        ],
        out_specs=pl.BlockSpec((2, lane_tile), lambda i: (0, i)),
        compiler_params=pltpu.CompilerParams(
            dimension_semantics=("parallel",),           # shardable across v7x's 2 TCs
            vmem_limit_bytes=32 * 1024 * 1024,           # tiles <= 32 KiB; safe on 64 MiB v7x
        ),
    )(m_flat, x_t)
    return out_t[:, :B].T                                  # back to (B, 2)


def quantum_discriminator(x, weights):
    """Module forward: qnn(x) followed by cat((e, 1-e), -1)."""
    return _pallas_forward(x, weights)


# ------------------------------------ pure-JAX reference -------------------------------------

def quantum_discriminator_ref(x, weights):
    x = x.astype(jnp.float32)
    a = build_ansatz_unitary(weights)
    c0, s0 = jnp.cos(x[:, 0] / 2), jnp.sin(x[:, 0] / 2)
    c1, s1 = jnp.cos(x[:, 1] / 2), jnp.sin(x[:, 1] / 2)
    psi0 = jnp.stack([c1 * c0, c1 * s0, s1 * c0, s1 * s0], axis=-1)
    psi = psi0 @ a.T
    z = jnp.array([1.0, -1.0, -1.0, 1.0], dtype=jnp.float32)
    e = jnp.sum(psi * psi * z, axis=-1, keepdims=True)
    return jnp.concatenate([e, 1.0 - e], axis=-1)


if __name__ == "__main__":
    key = jax.random.PRNGKey(0)
    kx, kw = jax.random.split(key)

    weights = jax.random.uniform(kw, (N_WEIGHTS,), jnp.float32, minval=-jnp.pi, maxval=jnp.pi)

    # Small batch consistent with the module's forward: x has shape (batch, 2 qubits).
    batch = 8
    x = jax.random.uniform(kx, (batch, N_QUBITS), jnp.float32, minval=0.0, maxval=jnp.pi)

    out = jax.block_until_ready(quantum_discriminator(x, weights))
    ref = quantum_discriminator_ref(x, weights)
    assert out.shape == (batch, 2)
    assert jnp.allclose(out, ref, atol=1e-5, rtol=1e-5), "Pallas kernel mismatch vs reference"
    assert jnp.allclose(out[:, 0] + out[:, 1], 1.0, atol=1e-5), "cat((x, 1-x)) invariant broken"

    # A non-multiple-of-128 batch exercises padding + a multi-tile grid (lane_tile = 128).
    batch2 = 300
    x2 = jax.random.uniform(jax.random.PRNGKey(1), (batch2, N_QUBITS), jnp.float32,
                            minval=0.0, maxval=jnp.pi)
    out2 = jax.block_until_ready(_pallas_forward(x2, weights, lane_tile_max=128))
    ref2 = quantum_discriminator_ref(x2, weights)
    assert out2.shape == (batch2, 2)
    assert jnp.allclose(out2, ref2, atol=1e-5, rtol=1e-5), "multi-tile Pallas mismatch"

    print("KERNEL_OK")
</pallas_src>

<mosaic_0001>
module attributes {stable_mosaic.version = 11 : i64} {
  func.func @qdisc_kernel(%arg0: i32, %arg1: memref<16xf32, #tpu.memory_space<smem>>, %arg2: memref<2x128xf32, #tpu.memory_space<vmem>>, %arg3: memref<2x128xf32, #tpu.memory_space<vmem>>) attributes {dimension_semantics = [#tpu.dimension_semantics<parallel>], iteration_bounds = array<i64: 1>, scalar_prefetch = 0 : i64, scratch_operands = 0 : i64, tpu.core_type = #tpu.core_type<tc>, window_params = [{transform_indices = @transform_0, window_bounds = array<i64: 16>}, {transform_indices = @transform_1, window_bounds = array<i64: 2, 128>}, {transform_indices = @transform_2, window_bounds = array<i64: 2, 128>}]} {
    %c0 = arith.constant 0 : index
    %c0_0 = arith.constant 0 : index
    %0 = vector.load %arg2[%c0, %c0_0] : memref<2x128xf32, #tpu.memory_space<vmem>>, vector<2x128xf32>
    %cst = arith.constant 5.000000e-01 : f32
    %1 = vector.broadcast %cst : f32 to vector<2x128xf32>
    %2 = arith.mulf %0, %1 : vector<2x128xf32>
    %3 = math.cos %2 : vector<2x128xf32>
    %4 = math.sin %2 : vector<2x128xf32>
    %5 = vector.extract_strided_slice %3 {offsets = [0, 0], sizes = [1, 128], strides = [1, 1]} : vector<2x128xf32> to vector<1x128xf32>
    %6 = vector.extract_strided_slice %4 {offsets = [0, 0], sizes = [1, 128], strides = [1, 1]} : vector<2x128xf32> to vector<1x128xf32>
    %7 = vector.extract_strided_slice %3 {offsets = [1, 0], sizes = [1, 128], strides = [1, 1]} : vector<2x128xf32> to vector<1x128xf32>
    %8 = vector.extract_strided_slice %4 {offsets = [1, 0], sizes = [1, 128], strides = [1, 1]} : vector<2x128xf32> to vector<1x128xf32>
    %9 = arith.mulf %7, %5 : vector<1x128xf32>
    %10 = arith.mulf %7, %6 : vector<1x128xf32>
    %11 = arith.mulf %8, %5 : vector<1x128xf32>
    %12 = arith.mulf %8, %6 : vector<1x128xf32>
    %c0_1 = arith.constant 0 : index
    %13 = memref.load %arg1[%c0_1] : memref<16xf32, #tpu.memory_space<smem>>
    %14 = arith.mulf %9, %9 : vector<1x128xf32>
    %15 = vector.broadcast %13 : f32 to vector<1x128xf32>
    %16 = arith.mulf %15, %14 : vector<1x128xf32>
    %c5 = arith.constant 5 : index
    %17 = memref.load %arg1[%c5] : memref<16xf32, #tpu.memory_space<smem>>
    %18 = arith.mulf %10, %10 : vector<1x128xf32>
    %19 = vector.broadcast %17 : f32 to vector<1x128xf32>
    %20 = arith.mulf %19, %18 : vector<1x128xf32>
    %21 = arith.addf %16, %20 : vector<1x128xf32>
    %c10 = arith.constant 10 : index
    %22 = memref.load %arg1[%c10] : memref<16xf32, #tpu.memory_space<smem>>
    %23 = arith.mulf %11, %11 : vector<1x128xf32>
    %24 = vector.broadcast %22 : f32 to vector<1x128xf32>
    %25 = arith.mulf %24, %23 : vector<1x128xf32>
    %26 = arith.addf %21, %25 : vector<1x128xf32>
    %c15 = arith.constant 15 : index
    %27 = memref.load %arg1[%c15] : memref<16xf32, #tpu.memory_space<smem>>
    %28 = arith.mulf %12, %12 : vector<1x128xf32>
    %29 = vector.broadcast %27 : f32 to vector<1x128xf32>
    %30 = arith.mulf %29, %28 : vector<1x128xf32>
    %31 = arith.addf %26, %30 : vector<1x128xf32>
    %c1 = arith.constant 1 : index
    %32 = memref.load %arg1[%c1] : memref<16xf32, #tpu.memory_space<smem>>
    %33 = arith.mulf %9, %10 : vector<1x128xf32>
    %34 = vector.broadcast %32 : f32 to vector<1x128xf32>
    %35 = arith.mulf %34, %33 : vector<1x128xf32>
    %c2 = arith.constant 2 : index
    %36 = memref.load %arg1[%c2] : memref<16xf32, #tpu.memory_space<smem>>
    %37 = arith.mulf %9, %11 : vector<1x128xf32>
    %38 = vector.broadcast %36 : f32 to vector<1x128xf32>
    %39 = arith.mulf %38, %37 : vector<1x128xf32>
    %40 = arith.addf %35, %39 : vector<1x128xf32>
    %c3 = arith.constant 3 : index
    %41 = memref.load %arg1[%c3] : memref<16xf32, #tpu.memory_space<smem>>
    %42 = arith.mulf %9, %12 : vector<1x128xf32>
    %43 = vector.broadcast %41 : f32 to vector<1x128xf32>
    %44 = arith.mulf %43, %42 : vector<1x128xf32>
    %45 = arith.addf %40, %44 : vector<1x128xf32>
    %c6 = arith.constant 6 : index
    %46 = memref.load %arg1[%c6] : memref<16xf32, #tpu.memory_space<smem>>
    %47 = arith.mulf %10, %11 : vector<1x128xf32>
    %48 = vector.broadcast %46 : f32 to vector<1x128xf32>
    %49 = arith.mulf %48, %47 : vector<1x128xf32>
    %50 = arith.addf %45, %49 : vector<1x128xf32>
    %c7 = arith.constant 7 : index
    %51 = memref.load %arg1[%c7] : memref<16xf32, #tpu.memory_space<smem>>
    %52 = arith.mulf %10, %12 : vector<1x128xf32>
    %53 = vector.broadcast %51 : f32 to vector<1x128xf32>
    %54 = arith.mulf %53, %52 : vector<1x128xf32>
    %55 = arith.addf %50, %54 : vector<1x128xf32>
    %c11 = arith.constant 11 : index
    %56 = memref.load %arg1[%c11] : memref<16xf32, #tpu.memory_space<smem>>
    %57 = arith.mulf %11, %12 : vector<1x128xf32>
    %58 = vector.broadcast %56 : f32 to vector<1x128xf32>
    %59 = arith.mulf %58, %57 : vector<1x128xf32>
    %60 = arith.addf %55, %59 : vector<1x128xf32>
    %cst_2 = arith.constant 2.000000e+00 : f32
    %61 = vector.broadcast %cst_2 : f32 to vector<1x128xf32>
    %62 = arith.mulf %61, %60 : vector<1x128xf32>
    %63 = arith.addf %31, %62 : vector<1x128xf32>
    %c0_3 = arith.constant 0 : index
    %c0_4 = arith.constant 0 : index
    %64 = vector.load %arg3[%c0_3, %c0_4] : memref<2x128xf32, #tpu.memory_space<vmem>>, vector<1x128xf32>
    tpu.vector_store %arg3[%c0_3, %c0_4], %63 {strides = array<i32>} : memref<2x128xf32, #tpu.memory_space<vmem>>, vector<1x128xf32>,
    %cst_5 = arith.constant 1.000000e+00 : f32
    %65 = vector.broadcast %cst_5 : f32 to vector<1x128xf32>
    %66 = arith.subf %65, %63 : vector<1x128xf32>
    %c1_6 = arith.constant 1 : index
    %c0_7 = arith.constant 0 : index
    %67 = vector.load %arg3[%c1_6, %c0_7] : memref<2x128xf32, #tpu.memory_space<vmem>>, vector<1x128xf32>
    tpu.vector_store %arg3[%c1_6, %c0_7], %66 {strides = array<i32>} : memref<2x128xf32, #tpu.memory_space<vmem>>, vector<1x128xf32>,
    return
  }
  func.func @transform_0(%arg0: i32) -> i32 {
    %c0_i32 = arith.constant 0 : i32
    %c0_i32_0 = arith.constant 0 : i32
    return %c0_i32 : i32
  }
  func.func @transform_1(%arg0: i32) -> (i32, i32) {
    %c0_i32 = arith.constant 0 : i32
    %c0_i32_0 = arith.constant 0 : i32
    return %c0_i32, %arg0 : i32, i32
  }
  func.func @transform_2(%arg0: i32) -> (i32, i32) {
    %c0_i32 = arith.constant 0 : i32
    %c0_i32_0 = arith.constant 0 : i32
    return %c0_i32, %arg0 : i32, i32
  }
}

</mosaic_0001>

<bundles_post_ra>
// kernel: tpu_custom_call.1
= control target key start
LH: loop header
LB: loop body
LE: loop exit
PB: predicated region body
PF: predicated region fallthrough
CT: control target
= control target key end

     0   :  { %7 = vsyncpa [#allocation5], 0  ;;  %s632_s0 = inlined_call_operand.hbm [shape: f32[16], index: 0, kind: input, shape index: {}]   ;;  %s633_s1 = inlined_call_operand.hbm [shape: f32[2,128], index: 1, kind: input, shape index: {}]   ;;  %s634_s2 = inlined_call_operand.hbm [shape: f32[2,128], index: 2, kind: output, shape index: {}]  }
   0x1   :  { %8 = vsyncpa [#allocation3], 0 }
   0x2   :  { %9 = vsyncpa [#allocation4], 0  ;;  %s15_s11 = sshll.u32 %s632_s0, 4  ;;  %s24_s14 = sshll.u32 %s633_s1, 4  ;;  %s16_s11 = int_to_ptr.hbm [resolvable:$true] %s15_s11  ;;  %s25_s14 = int_to_ptr.hbm [resolvable:$true] %s24_s14 }
   0x3   :  { %s522_s15 = smov [#allocation2]   ;;  %s523_s16 = smov [#allocation6]  }
   0x4   :  { %18 = dma.hbm_to_smem %s16_s11, 16, %s522_s15, [#allocation5]  }
   0x5   :  { %s26_s17 = sshll.u32 %s523_s16, 4  ;;  %s27_s17 = int_to_ptr.vmem [resolvable:$true] %s26_s17 }
   0x6   :  { %29 = dma.hbm_to_vmem [thread:$0]  %s25_s14, 32, %s27_s17, [#allocation3]  }
   0x7   :  { %516 = dma.done.wait [#allocation5], 16  }
   0x8   :  { %517 = vsyncadd [#allocation5], 4294967280 }
   0x9   :  { %518 = dma.done.wait [#allocation3], 32  }
   0xa   :  { %519 = vsyncadd [#allocation3], 4294967264 }
   0xb   :  { %38 = sfence }
   0xc   :  { %v39_v0 = vld [vmem:[#allocation6] sm:$0x3]  ;;  %v524_v13 = vmov 683565275   ;;  %v525_v15 = vmov 2475754826  }
   0xd   :  { %v553_v1 = vmul.f32 0.5, %v39_v0  ;;  %v526_v17 = vmov 2131351028   ;;  %v527_v19 = vmov 2102212464   ;;  %s598_s0 = sld [smem:[#allocation2]] }
   0xe   :  { %v528_v21 = vmov 920167782   ;;  %v529_v27 = vmov 1326507024   ;;  %s600_s1 = sld [smem:[#allocation2 + $0x5]]  ;;  %s531_s26 = smov [#allocation7]  }
   0xf   :  { %v44_v2 = vand.u32 2139095040, %v553_v1  ;;  %v41_v4 = vand.u32 2147483647, %v553_v1  ;;  %vm43_vm12 = vcmp.lt.s32.totalorder %v553_v1, 0  ;;  %s602_s18 = sld [smem:[#allocation2 + $0xa]]  ;;  %s418_s27 = sshll.u32 %s531_s26, 4  ;;  %s419_s27 = int_to_ptr.vmem [resolvable:$true] %s418_s27 }
  0x10   :  { %s604_s19 = sld [smem:[#allocation2 + $0x1]]  ;;  %s420_s30 = sshll.u32 %s634_s2, 4  ;;  %s421_s30 = int_to_ptr.hbm [resolvable:$true] %s420_s30 }
  0x11   :  { %v45_v3 = vshrl.u32 %v44_v2, 23  ;;  %v48_v7 = vand.u32 8388607, %v41_v4  ;;  %v530_v2 = vmov 0   ;;  %vm42_vm13 = vcmp.le.f32.partialorder %v41_v4, 0.7853982 }
  0x12   :  { %s606_s20 = sld [smem:[#allocation2 + $0x2]] }
  0x13   :  { %v431_v5 = vadd.s32 4294967169, %v45_v3  ;;  %v49_v10 = vor.u32 8388608, %v48_v7  ;;  %s609_s21 = sld [smem:[#allocation2 + $0x3]] }
  0x14   :  { %s611_s22 = sld [smem:[#allocation2 + $0x6]] }
  0x15   :  { %v51_v6 = vadd.s32 1, %v431_v5  ;;  %v562_v29 = vshll.u32 %v49_v10, 8  ;;  %s613_s23 = sld [smem:[#allocation2 + $0x7]] }
  0x16   :  { %s616_s24 = sld [smem:[#allocation2 + $0xf]] }
  0x17   :  { %vm52_vm0 = vcmp.gt.s32.totalorder %v51_v6, 0  ;;  %v90_v41 = vand.u32 65535, %v562_v29  ;;  %v91_v42 = vshrl.u32 %v562_v29, 16  ;;  %s618_s25 = sld [smem:[#allocation2 + $0xb]] }
  0x18   :  { %v53_v8 = vsel %vm52_vm0, %v51_v6, 0 }
  0x19   :  { %v55_v9 = vand.u32 31, %v53_v8  ;;  %v559_v11 = vshrl.u32 %v53_v8, 5 }
  0x1b   :  { %v56_v12 = vsub.s32 32, %v55_v9  ;;  %v58_v14 = vshll.u32 %v524_v13, %v55_v9  ;;  %v61_v16 = vshll.u32 %v525_v15, %v55_v9  ;;  %v64_v18 = vshll.u32 %v526_v17, %v55_v9 }
  0x1c   :  { %v67_v20 = vshll.u32 %v527_v19, %v55_v9  ;;  %v70_v22 = vshll.u32 %v528_v21, %v55_v9  ;;  %vm73_vm1 = vcmp.lt.s32.totalorder %v559_v11, 1  ;;  %vm76_vm2 = vcmp.lt.s32.totalorder %v559_v11, 4 }
  0x1d   :  { %v59_v23 = vshrl.u32 %v525_v15, %v56_v12  ;;  %v62_v24 = vshrl.u32 %v526_v17, %v56_v12  ;;  %v65_v25 = vshrl.u32 %v527_v19, %v56_v12  ;;  %v68_v26 = vshrl.u32 %v528_v21, %v56_v12 }
  0x1e   :  { %v71_v28 = vshrl.u32 %v529_v27, %v56_v12  ;;  %vm75_vm3 = vcmp.lt.s32.totalorder %v559_v11, 3  ;;  %vm74_vm4 = vcmp.lt.s32.totalorder %v559_v11, 2  ;;  %v57_v49 = vshrl.u32 %v524_v13, %v56_v12 }
  0x1f   :  { %v60_v30 = vor.u32 %v59_v23, %v58_v14  ;;  %v63_v31 = vor.u32 %v62_v24, %v61_v16  ;;  %v66_v32 = vor.u32 %v65_v25, %v64_v18  ;;  %v69_v33 = vor.u32 %v68_v26, %v67_v20 }
  0x20   :  { %v72_v34 = vor.u32 %v71_v28, %v70_v22 }
  0x21   :  { %v81_v35 = vsel %vm73_vm1, %v60_v30, %v63_v31  ;;  %v85_v36 = vsel %vm73_vm1, %v63_v31, %v66_v32  ;;  %v82_v37 = vsel %vm76_vm2, %v69_v33, 920167782  ;;  %v77_v62 = vsel %vm73_vm1, %v57_v49, %v60_v30 }
  0x22   :  { %v86_v38 = vsel %vm76_vm2, %v72_v34, 1326507024  ;;  %v83_v39 = vsel %vm75_vm3, %v66_v32, %v82_v37  ;;  %v78_v0 = vsel %vm76_vm2, %v66_v32, 2102212464 }
  0x23   :  { %v87_v40 = vsel %vm75_vm3, %v69_v33, %v86_v38  ;;  %v84_v43 = vsel %vm74_vm4, %v81_v35, %v83_v39  ;;  %v79_v13 = vsel %vm75_vm3, %v63_v31, %v78_v0 }
  0x24   :  { %v88_v44 = vsel %vm74_vm4, %v85_v36, %v87_v40  ;;  %v114_v47 = vand.u32 65535, %v84_v43  ;;  %v115_v48 = vshrl.u32 %v84_v43, 16  ;;  %v80_v21 = vsel %vm74_vm4, %v77_v62, %v79_v13 }
  0x25   :  { %v92_v45 = vand.u32 65535, %v88_v44  ;;  %v93_v46 = vshrl.u32 %v88_v44, 16  ;;  %v134_v25 = vmul.u32 %v562_v29, %v80_v21  ;;  %vm184_vm4 = vweird.f32 %v553_v1 }
  0x26   :  { %v116_v53 = vmul.u32 %v114_v47, %v90_v41  ;;  %v117_v54 = vmul.u32 %v115_v48, %v90_v41  ;;  %v118_v55 = vmul.u32 %v114_v47, %v91_v42  ;;  %v119_v59 = vmul.u32 %v115_v48, %v91_v42 }
  0x27   :  { %v94_v50 = vmul.u32 %v92_v45, %v90_v41  ;;  %v95_v51 = vmul.u32 %v93_v46, %v90_v41  ;;  %v96_v52 = vmul.u32 %v92_v45, %v91_v42  ;;  %v97_v56 = vmul.u32 %v93_v46, %v91_v42 }
  0x28   :  { %v120_v60 = vshll.u32 %v117_v54, 16  ;;  %v122_v61 = vshll.u32 %v118_v55, 16  ;;  %v121_v10 = vshrl.u32 %v117_v54, 16  ;;  %v123_v17 = vshrl.u32 %v118_v55, 16 }
  0x29   :  { %v98_v57 = vshll.u32 %v95_v51, 16  ;;  %v100_v58 = vshll.u32 %v96_v52, 16  ;;  %v99_v6 = vshrl.u32 %v95_v51, 16  ;;  %v101_v14 = vshrl.u32 %v96_v52, 16 }
  0x2a   :  { %vm124_vm6 = vc.u32 %v116_v53, %v120_v60  ;;  %v126_v5 = vadd.s32 %v120_v60, %v116_v53 }
  0x2b   :  { %vm102_vm5 = vc.u32 %v94_v50, %v98_v57  ;;  %v104_v63 = vadd.s32 %v98_v57, %v94_v50  ;;  %v125_v8 = vsel %vm124_vm6, 1, %v530_v2 }
  0x2c   :  { %v103_v3 = vsel %vm102_vm5, 1, %v530_v2  ;;  %v127_v12 = vadd.s32 %v125_v8, %v119_v59  ;;  %vm128_vm8 = vc.u32 %v126_v5, %v122_v61  ;;  %v130_v20 = vadd.s32 %v126_v5, %v122_v61 }
  0x2d   :  { %v105_v7 = vadd.s32 %v103_v3, %v97_v56  ;;  %vm106_vm7 = vc.u32 %v104_v63, %v100_v58  ;;  %v129_v16 = vsel %vm128_vm8, 1, %v530_v2 }
  0x2e   :  { %v107_v9 = vsel %vm106_vm7, 1, %v530_v2  ;;  %v131_v18 = vadd.s32 %v129_v16, %v127_v12 }
  0x2f   :  { %v109_v15 = vadd.s32 %v107_v9, %v105_v7 }
  0x30   :  { %v132_v22 = vadd.s32 %v131_v18, %v121_v10 }
  0x31   :  { %v110_v19 = vadd.s32 %v109_v15, %v99_v6 }
  0x32   :  { %v133_v24 = vadd.s32 %v132_v22, %v123_v17 }
  0x33   :  { %v111_v23 = vadd.s32 %v110_v19, %v101_v14 }
  0x34   :  { %v137_v26 = vadd.s32 1, %v133_v24 }
  0x35   :  { %vm136_vm9 = vc.u32 %v111_v23, %v130_v20  ;;  %v135_v11 = vadd.s32 %v130_v20, %v111_v23 }
  0x36   :  { %v138_v27 = vsel %vm136_vm9, %v137_v26, %v133_v24  ;;  %v366_v26 = vstv %s600_s1 }
  0x37   :  { %v139_v28 = vadd.s32 %v138_v27, %v134_v25  ;;  %v371_v27 = vstv %s602_s18 }
  0x39   :  { %v140_v30 = vadd.s32 536870912, %v139_v28 }
  0x3b   :  { %v141_v31 = vshrl.u32 %v140_v30, 30  ;;  %v385_v30 = vstv %s606_s20 }
  0x3d   :  { %v142_v32 = vshll.u32 %v141_v31, 30  ;;  %v165_v49 = vsub.s32 4, %v141_v31 }
  0x3f   :  { %v143_v33 = vsub.s32 %v139_v28, %v142_v32  ;;  %v166_v52 = vsel %vm43_vm12, %v165_v49, %v141_v31  ;;  %v381_v28 = vstv %s604_s19 }
  0x40   :  { %v168_v55 = vsel %vm42_vm13, 0, %v166_v52  ;;  %v405_v52 = vstv %s618_s25 }
  0x41   :  { %vm144_vm10 = vcmp.lt.s32.totalorder %v143_v33, 0  ;;  %v145_v34 = vsub.s32 0, %v143_v33  ;;  %v339_v60 = vadd.s32 3, %v168_v55  ;;  %v185_v2 = vand.u32 3, %v168_v55 }
  0x43   :  { %v146_v35 = vsel %vm144_vm10, %v145_v34, %v143_v33  ;;  %v340_v3 = vand.u32 3, %v339_v60  ;;  %vm190_vm14 = vcmp.eq.s32.totalorder %v185_v2, 2  ;;  %vm186_vm0 = vcmp.lt.s32.totalorder %v185_v2, 2 }
  0x44   :  { %v147_v36 = vclz %v146_v35  ;;  %vm187_vm1 = vcmp.eq.s32.totalorder %v185_v2, 0  ;;  %v390_v34 = vstv %s609_s21 }
  0x45   :  { %vm345_vm15 = vcmp.eq.s32.totalorder %v340_v3, 2  ;;  %vm342_vm2 = vcmp.eq.s32.totalorder %v340_v3, 0  ;;  %vm341_vm3 = vcmp.lt.s32.totalorder %v340_v3, 2 }
  0x46   :  { %v432_v37 = vadd.s32 4294967294, %v147_v36 }
  0x48   :  { %vm433_vm11 = vcmp.lt.s32.totalorder %v432_v37, 0 }
  0x49   :  { %v150_v38 = vsel %vm433_vm11, 0, %v432_v37 }
  0x4a   :  { %v151_v39 = vsub.s32 32, %v150_v38  ;;  %v152_v40 = vshll.u32 %v143_v33, %v150_v38  ;;  %v155_v41 = vsub.s32 4294967266, %v150_v38 }
  0x4c   :  { %v153_v29 = vshrl.u32 %v135_v11, %v151_v39  ;;  %v156_v42 = vadd.s32 127, %v155_v41 }
  0x4e   :  { %v154_v43 = vor.u32 %v153_v29, %v152_v40  ;;  %v157_v44 = vshll.u32 %v156_v42, 23  ;;  %v395_v40 = vstv %s611_s22 }
  0x50   :  { %v158_v45 = vor.u32 4788187, %v157_v44  ;;  %v161_v46 = vcvt.s32.f32 %v154_v43 }
  0x52   :  { %v159_v47 = vand.u32 2147483647, %v158_v45 }
  0x54   :  { %v162_v48 = vmul.f32 %v161_v46, %v159_v47  ;;  %v400_v46 = vstv %s613_s23 }
  0x56   :  { %v163_v50 = vxor.u32 2147483648, %v162_v48 }
  0x58   :  { %v164_v51 = vsel %vm43_vm12, %v163_v50, %v162_v48 }
  0x59   :  { %v167_v53 = vsel %vm42_vm13, %v553_v1, %v164_v51  ;;  %v362_v1 = vstv %s598_s0  ;;  %v376_v51 = vstv %s616_s24 }
  0x5a   :  { %v169_v54 = vmul.f32 %v167_v53, %v167_v53 }
  0x5c   :  { %v170_v56 = vmul.f32 -0.001358992, %v169_v54  ;;  %v177_v57 = vmul.f32 -0.00019511016, %v169_v54 }
  0x5e   :  { %v171_v58 = vadd.f32 0.041655596, %v170_v56  ;;  %v178_v59 = vadd.f32 0.008332121, %v177_v57 }
  0x60   :  { %v172_v61 = vmul.f32 %v171_v58, %v169_v54  ;;  %v179_v62 = vmul.f32 %v178_v59, %v169_v54 }
  0x62   :  { %v173_v63 = vadd.f32 -0.4999988, %v172_v61  ;;  %v180_v0 = vadd.f32 -0.16666654, %v179_v62 }
  0x64   :  { %v174_v5 = vmul.f32 %v173_v63, %v169_v54  ;;  %v181_v4 = vmul.f32 %v180_v0, %v169_v54 }
  0x66   :  { %v175_v6 = vadd.f32 1.0, %v174_v5  ;;  %v182_v7 = vadd.f32 1.0, %v181_v4 }
  0x68   :  { %v183_v8 = vmul.f32 %v182_v7, %v167_v53  ;;  %v191_v9 = vxor.u32 2147483648, %v175_v6 }
  0x6a   :  { %v188_v10 = vxor.u32 2147483648, %v183_v8  ;;  %v192_v12 = vsel %vm190_vm14, %v191_v9, %v183_v8  ;;  %v347_v13 = vsel %vm345_vm15, %v191_v9, %v183_v8 }
  0x6c   :  { %v189_v14 = vsel %vm187_vm1, %v175_v6, %v188_v10  ;;  %v344_v15 = vsel %vm342_vm2, %v175_v6, %v188_v10 }
  0x6d   :  { %v193_v16 = vsel %vm186_vm0, %v189_v14, %v192_v12  ;;  %v348_v17 = vsel %vm341_vm3, %v344_v15, %v347_v13 }
  0x6e   :  { %v194_v18 = vsel %vm184_vm4, nan, %v193_v16  ;;  %v349_v19 = vsel %vm184_vm4, nan, %v348_v17 }
  0x6f   :  { %v351_v20 = vrot.slane %v194_v18, 7  ;;  %v355_v21 = vrot.slane %v349_v19, 7 }
  0x71   :  { %v353_v22 = vmul.f32 %v351_v20, %v194_v18  ;;  %v357_v23 = vmul.f32 %v355_v21, %v194_v18  ;;  %v358_v24 = vmul.f32 %v351_v20, %v349_v19  ;;  %v359_v25 = vmul.f32 %v355_v21, %v349_v19 }
  0x73   :  { %v361_v31 = vmul.f32 %v353_v22, %v353_v22  ;;  %v365_v32 = vmul.f32 %v357_v23, %v357_v23  ;;  %v370_v33 = vmul.f32 %v358_v24, %v358_v24  ;;  %v380_v35 = vmul.f32 %v357_v23, %v353_v22 }
  0x74   :  { %v384_v36 = vmul.f32 %v358_v24, %v353_v22  ;;  %v389_v37 = vmul.f32 %v359_v25, %v353_v22  ;;  %v394_v11 = vmul.f32 %v358_v24, %v357_v23  ;;  %v375_v44 = vmul.f32 %v359_v25, %v359_v25 }
  0x75   :  { %v363_v38 = vmul.f32 %v362_v1, %v361_v31  ;;  %v367_v39 = vmul.f32 %v366_v26, %v365_v32  ;;  %v382_v41 = vmul.f32 %v381_v28, %v380_v35  ;;  %v372_v43 = vmul.f32 %v371_v27, %v370_v33 }
  0x76   :  { %v386_v29 = vmul.f32 %v385_v30, %v384_v36  ;;  %v391_v42 = vmul.f32 %v390_v34, %v389_v37  ;;  %v399_v45 = vmul.f32 %v359_v25, %v357_v23  ;;  %v396_v49 = vmul.f32 %v395_v40, %v394_v11 }
  0x77   :  { %v368_v47 = vadd.f32 %v367_v39, %v363_v38  ;;  %v404_v50 = vmul.f32 %v359_v25, %v358_v24  ;;  %v377_v56 = vmul.f32 %v376_v51, %v375_v44 }
  0x78   :  { %v387_v48 = vadd.f32 %v386_v29, %v382_v41  ;;  %v401_v54 = vmul.f32 %v400_v46, %v399_v45 }
  0x79   :  { %v373_v55 = vadd.f32 %v372_v43, %v368_v47  ;;  %v406_v58 = vmul.f32 %v405_v52, %v404_v50 }
  0x7a   :  { %v392_v53 = vadd.f32 %v391_v42, %v387_v48 }
  0x7b   :  { %v378_v60 = vadd.f32 %v377_v56, %v373_v55 }
  0x7c   :  { %v397_v57 = vadd.f32 %v396_v49, %v392_v53 }
  0x7e   :  { %v402_v59 = vadd.f32 %v401_v54, %v397_v57 }
  0x80   :  { %v407_v61 = vadd.f32 %v406_v58, %v402_v59 }
  0x82   :  { %v408_v62 = vmul.f32 2.0, %v407_v61 }
  0x84   :  { %v409_v63 = vadd.f32 %v408_v62, %v378_v60 }
  0x86   :  { %410 = vst [vmem:[#allocation7 - $0x1] sm:$0x2] %v409_v63  ;;  %v411_v0 = vsub.f32 1.0, %v409_v63 }
  0x88   :  { %412 = vst [vmem:[#allocation7] sm:$0x2] %v411_v0 }
  0x89   :  { %423 = dma.vmem_to_hbm [thread:$0]  %s419_s27, 32, %s421_s30, [#allocation4]  }
  0x8a   :  { %520 = dma.done.wait [#allocation4], 32  }
  0x8b   :  { %521 = vsyncadd [#allocation4], 4294967264 }
  0x8c   :  { %428 = vsyncpa [#allocation3], 1 }
  0x8d   :  { %429 = vsyncpa [#allocation4], 1 }
  0x8e   :  { %430 = vsyncpa [#allocation5], 1 }

</bundles_post_ra>
